<compile_context>
chip_gen: v5e
topology: v5e:2x2
jax: 0.10.0
libtpu: 0.0.40
codegen_flags: <defaults>
</compile_context>

<pallas_src>
import functools

import jax
import jax.numpy as jnp
from jax import lax
from jax.experimental import pallas as pl
from jax.experimental.pallas import tpu as pltpu


def gaussian_attention_kernel(x_ref, w_beta_ref, w_kappa_ref, kprev_ref,
                              ctx_ref, out_ref, attn_ref, kappa_ref,
                              acc_ref, beta_sc, kappa_sc,
                              *, seq_len, has_tail):
    j = pl.program_id(1)                       # L-tile index (reduction axis)
    bb, bl = attn_ref.shape                    # static tile sizes

    @pl.when(j == 0)
    def _init():
        x = x_ref[...]                                             # (bb, D)
        # beta / kappa increment as VPU multiply + lane reductions against
        # lane-major (1, D) weight rows (avoids a 2-column MXU matmul).
        beta = jnp.exp(jnp.sum(x * w_beta_ref[...], axis=-1, keepdims=True))
        kappa = kprev_ref[...] + jnp.exp(
            jnp.sum(x * w_kappa_ref[...], axis=-1, keepdims=True))
        beta_sc[...] = beta                                        # (bb, 1)
        kappa_sc[...] = kappa                                      # (bb, 1)
        kappa_ref[...] = kappa          # written once per batch tile
        acc_ref[...] = jnp.zeros_like(acc_ref)

    beta = beta_sc[...]                                            # (bb, 1)
    kappa = kappa_sc[...]                                          # (bb, 1)

    # Global positions covered by this L tile; idx = l / L exactly matches
    # the reference (no precomputed reciprocal).
    pos = lax.broadcasted_iota(jnp.int32, (1, bl), 1) + j * bl     # (1, bl)
    idx = pos.astype(jnp.float32) / jnp.float32(seq_len)

    # attn[b, l] = exp(-beta[b] * (kappa[b] - idx[l])**2)
    attn = jnp.exp(-beta * (kappa - idx) ** 2)                     # (bb, bl)
    if has_tail:
        # Zero attention weights for padded positions of the tail tile so
        # they contribute nothing to the weighted-context sum; out-of-bounds
        # attn output lanes are dropped by Pallas on writeback anyway.
        attn = jnp.where(pos < seq_len, attn, 0.0)
    attn_ref[...] = attn

    if has_tail:
        # Sublane-oriented validity mask for the (bl, D) context slabs: the
        # padded rows of an overhanging ctx tile are unspecified, so zero
        # them before feeding the MXU (0 * garbage could be NaN otherwise).
        pos_sub = lax.broadcasted_iota(jnp.int32, (bl, 1), 0) + j * bl

    # Weighted-context reduction on the MXU: per batch row a rank-2
    # (1, bl) @ (bl, D) matmul accumulated into the f32 (bb, D) scratch.
    # bb <= 8 (or full B for tiny B), so the static unroll stays small and
    # the MXU work hides entirely under the multi-MiB context DMA.
    for b in range(bb):
        c = ctx_ref[b]                                             # (bl, D)
        if has_tail:
            c = jnp.where(pos_sub < seq_len, c, 0.0)
        acc_ref[b:b + 1, :] += jnp.dot(attn[b:b + 1, :], c,
                                       preferred_element_type=jnp.float32)

    @pl.when(j == pl.num_programs(1) - 1)
    def _finalize():
        out_ref[...] = acc_ref[...].astype(out_ref.dtype)


def _pick_tile(full, target, align):
    """Largest tile <= target that is a multiple of `align` and divides `full`;
    falls back to the full dimension (a full-extent block is always legal)."""
    if full <= target:
        return full
    t = (target // align) * align
    while t >= align:
        if full % t == 0:
            return t
        t -= align
    return full


def gaussian_attention(x, context, kappa_prev, w_in,
                       *, ctx_buf_budget_bytes=8 * 1024 * 1024):
    """x: (B, D), context: (B, L, D), kappa_prev: (B,), w_in: (2, D)."""
    B, D = x.shape
    _, L, _ = context.shape

    x = x.astype(jnp.float32)
    context = context.astype(jnp.float32)
    kappa_prev_2d = jnp.asarray(kappa_prev, jnp.float32).reshape(B, 1)
    w_in = jnp.asarray(w_in, jnp.float32)
    w_beta = w_in[0:1, :]            # (1, D) lane-major row (no transpose)
    w_kappa = w_in[1:2, :]           # (1, D)

    # Batch tile: 8 sublanes when B divides (>= 2 parallel tiles for B >= 16,
    # so both v7x TensorCores are used), else the full B.
    bb = _pick_tile(B, 8, 8)

    # L tile: 128-lane aligned, sized so each f32 context buffer is ~8 MiB
    # (double-buffered: 16 MiB ctx + small attn/x/out buffers -- comfortably
    # under v7x's 64 MiB physical VMEM, and large enough that the ~0.35 us
    # per-grid-step overhead is <10% of the per-step HBM DMA on all gens).
    bl_cap = ctx_buf_budget_bytes // max(1, bb * D * 4)
    bl_cap = max(128, (bl_cap // 128) * 128)
    bl = L if L <= bl_cap else bl_cap          # full-extent block is legal
    n_l = -(-L // bl)                          # cdiv: tail tile is masked
    has_tail = (L % bl) != 0
    grid = (B // bb, n_l)

    kernel = functools.partial(gaussian_attention_kernel,
                               seq_len=L, has_tail=has_tail)

    cost = pl.CostEstimate(
        flops=2 * B * L * D + 4 * B * D,
        transcendentals=B * L + 2 * B,
        bytes_accessed=4 * (B * L * D + 2 * B * D + 2 * B * L + 2 * D + 3 * B),
    )

    out, attn, kappa = pl.pallas_call(
        kernel,
        out_shape=(
            jax.ShapeDtypeStruct((B, D), jnp.float32),
            jax.ShapeDtypeStruct((B, L), jnp.float32),
            jax.ShapeDtypeStruct((B, 1), jnp.float32),
        ),
        grid_spec=pltpu.PrefetchScalarGridSpec(
            num_scalar_prefetch=0,
            grid=grid,
            in_specs=[
                pl.BlockSpec((bb, D), lambda i, j: (i, 0)),         # x
                pl.BlockSpec((1, D), lambda i, j: (0, 0)),          # w_beta
                pl.BlockSpec((1, D), lambda i, j: (0, 0)),          # w_kappa
                pl.BlockSpec((bb, 1), lambda i, j: (i, 0)),         # kappa_prev
                pl.BlockSpec((bb, bl, D), lambda i, j: (i, j, 0)),  # context
            ],
            out_specs=[
                pl.BlockSpec((bb, D), lambda i, j: (i, 0)),         # out (acc)
                pl.BlockSpec((bb, bl), lambda i, j: (i, j)),        # attn
                pl.BlockSpec((bb, 1), lambda i, j: (i, 0)),         # kappa
            ],
            scratch_shapes=[
                pltpu.VMEM((bb, D), jnp.float32),   # context accumulator
                pltpu.VMEM((bb, 1), jnp.float32),   # beta (carried over L)
                pltpu.VMEM((bb, 1), jnp.float32),   # kappa (carried over L)
            ],
        ),
        compiler_params=pltpu.CompilerParams(
            dimension_semantics=("parallel", "arbitrary"),
            vmem_limit_bytes=48 * 1024 * 1024,      # <= ~48 MiB: safe on v7x
        ),
        cost_estimate=cost,
    )(x, w_beta, w_kappa, kappa_prev_2d, context)

    return out, attn, kappa[:, 0]


def gaussian_attention_ref(x, context, kappa_prev, w_in):
    """Pure-JAX reference mirroring the PyTorch forward (exact f32 math)."""
    pre = jnp.sum(x[:, None, :] * w_in[None, :, :], axis=-1)     # (B, 2)
    beta_kappa = jnp.exp(pre)
    beta = beta_kappa[:, 0]
    kappa = kappa_prev + beta_kappa[:, 1]
    L = context.shape[1]
    indexes = jnp.arange(L, dtype=jnp.float32) / L
    attn = jnp.exp(-beta[:, None] * (kappa[:, None] - indexes[None, :]) ** 2)
    context_combined = jnp.sum(attn[:, :, None] * context, axis=1)
    return context_combined, attn, kappa


def _run_case(B, L, D, seed, **kwargs):
    key = jax.random.fold_in(jax.random.PRNGKey(0), seed)
    k_x, k_ctx, k_kappa, k_win = jax.random.split(key, 4)

    x = jax.random.normal(k_x, (B, D), dtype=jnp.float32)
    context = jax.random.normal(k_ctx, (B, L, D), dtype=jnp.float32)
    kappa_prev = jax.random.uniform(k_kappa, (B,), dtype=jnp.float32)
    # nn.Linear(dim, 2, bias=False).weight: (2, dim), U(-1/sqrt(D), 1/sqrt(D)).
    bound = 1.0 / (D ** 0.5)
    w_in = jax.random.uniform(k_win, (2, D), minval=-bound, maxval=bound,
                              dtype=jnp.float32)
    # NOTE: linear_out (dim*2 -> dim) exists in __init__ but is unused in
    # forward(), so it is intentionally not materialized here.

    out, attn, kappa = gaussian_attention(x, context, kappa_prev, w_in, **kwargs)
    jax.block_until_ready((out, attn, kappa))

    out_r, attn_r, kappa_r = gaussian_attention_ref(x, context, kappa_prev, w_in)
    assert jnp.allclose(kappa, kappa_r, atol=1e-5, rtol=1e-5)
    assert jnp.allclose(attn, attn_r, atol=1e-5, rtol=1e-5)
    assert jnp.allclose(out, out_r, atol=2e-3, rtol=5e-4)


if __name__ == "__main__":
    # Small shapes implied by the module (batch=2, sourceL=8, dim=32):
    # single full-array blocks, grid collapses to (1, 1).
    _run_case(B=2, L=8, D=32, seed=0)
    # Larger shapes: bb=8 gives a 2-wide "parallel" B axis (megacore), and the
    # 8 MiB ctx budget yields a single full-L tile (grid (2, 1)).
    _run_case(B=16, L=1024, D=256, seed=1)
    # Non-128-multiple L with a forced small ctx budget: exercises the
    # multi-step L accumulation (pl.when init/finalize) and the masked tail.
    _run_case(B=8, L=200, D=128, seed=2, ctx_buf_budget_bytes=512 * 1024)
    print("KERNEL_OK")
</pallas_src>

<mosaic_0001>
module attributes {stable_mosaic.version = 11 : i64} {
  func.func @gaussian_attention_kernel(%arg0: i32, %arg1: i32, %arg2: memref<2x32xf32, #tpu.memory_space<vmem>>, %arg3: memref<1x32xf32, #tpu.memory_space<vmem>>, %arg4: memref<1x32xf32, #tpu.memory_space<vmem>>, %arg5: memref<2x1xf32, #tpu.memory_space<vmem>>, %arg6: memref<2x8x32xf32, #tpu.memory_space<vmem>>, %arg7: memref<2x32xf32, #tpu.memory_space<vmem>>, %arg8: memref<2x8xf32, #tpu.memory_space<vmem>>, %arg9: memref<2x1xf32, #tpu.memory_space<vmem>>, %arg10: memref<2x32xf32, #tpu.memory_space<vmem>>, %arg11: memref<2x1xf32, #tpu.memory_space<vmem>>, %arg12: memref<2x1xf32, #tpu.memory_space<vmem>>) attributes {dimension_semantics = [#tpu.dimension_semantics<parallel>, #tpu.dimension_semantics<arbitrary>], iteration_bounds = array<i64: 1, 1>, scalar_prefetch = 0 : i64, scratch_operands = 3 : i64, tpu.core_type = #tpu.core_type<tc>, window_params = [{transform_indices = @transform_0, window_bounds = array<i64: 2, 32>}, {pipeline_mode = #tpu.pipeline_mode<synchronous>, transform_indices = @transform_1, window_bounds = array<i64: 1, 32>}, {pipeline_mode = #tpu.pipeline_mode<synchronous>, transform_indices = @transform_2, window_bounds = array<i64: 1, 32>}, {transform_indices = @transform_3, window_bounds = array<i64: 2, 1>}, {transform_indices = @transform_4, window_bounds = array<i64: 2, 8, 32>}, {transform_indices = @transform_5, window_bounds = array<i64: 2, 32>}, {transform_indices = @transform_6, window_bounds = array<i64: 2, 8>}, {transform_indices = @transform_7, window_bounds = array<i64: 2, 1>}]} {
    %c0_i32 = arith.constant 0 : i32
    %0 = arith.cmpi eq, %arg1, %c0_i32 : i32
    %1 = arith.extui %0 : i1 to i32
    %c0_i32_0 = arith.constant 0 : i32
    %2 = arith.cmpi ne, %1, %c0_i32_0 : i32
    scf.if %2 {
      %c0_24 = arith.constant 0 : index
      %c0_25 = arith.constant 0 : index
      %39 = vector.load %arg2[%c0_24, %c0_25] : memref<2x32xf32, #tpu.memory_space<vmem>>, vector<2x32xf32>
      %c0_26 = arith.constant 0 : index
      %c0_27 = arith.constant 0 : index
      %40 = vector.load %arg3[%c0_26, %c0_27] : memref<1x32xf32, #tpu.memory_space<vmem>>, vector<1x32xf32>
      %41 = vector.broadcast %40 : vector<1x32xf32> to vector<2x32xf32>
      %42 = arith.mulf %39, %41 : vector<2x32xf32>
      %cst_28 = arith.constant dense<0.000000e+00> : vector<2xf32>
      %43 = vector.multi_reduction <add>, %42, %cst_28 [1] : vector<2x32xf32> to vector<2xf32>
      %44 = vector.shape_cast %43 : vector<2xf32> to vector<2x1xf32>
      %45 = math.exp %44 : vector<2x1xf32>
      %c0_29 = arith.constant 0 : index
      %c0_30 = arith.constant 0 : index
      %46 = vector.load %arg5[%c0_29, %c0_30] : memref<2x1xf32, #tpu.memory_space<vmem>>, vector<2x1xf32>
      %c0_31 = arith.constant 0 : index
      %c0_32 = arith.constant 0 : index
      %47 = vector.load %arg4[%c0_31, %c0_32] : memref<1x32xf32, #tpu.memory_space<vmem>>, vector<1x32xf32>
      %48 = vector.broadcast %47 : vector<1x32xf32> to vector<2x32xf32>
      %49 = arith.mulf %39, %48 : vector<2x32xf32>
      %cst_33 = arith.constant dense<0.000000e+00> : vector<2xf32>
      %50 = vector.multi_reduction <add>, %49, %cst_33 [1] : vector<2x32xf32> to vector<2xf32>
      %51 = vector.shape_cast %50 : vector<2xf32> to vector<2x1xf32>
      %52 = math.exp %51 : vector<2x1xf32>
      %53 = arith.addf %46, %52 : vector<2x1xf32>
      %c0_34 = arith.constant 0 : index
      %c0_35 = arith.constant 0 : index
      %54 = vector.load %arg11[%c0_34, %c0_35] : memref<2x1xf32, #tpu.memory_space<vmem>>, vector<2x1xf32>
      tpu.vector_store %arg11[%c0_34, %c0_35], %45 {strides = array<i32>} : memref<2x1xf32, #tpu.memory_space<vmem>>, vector<2x1xf32>,
      %c0_36 = arith.constant 0 : index
      %c0_37 = arith.constant 0 : index
      %55 = vector.load %arg12[%c0_36, %c0_37] : memref<2x1xf32, #tpu.memory_space<vmem>>, vector<2x1xf32>
      tpu.vector_store %arg12[%c0_36, %c0_37], %53 {strides = array<i32>} : memref<2x1xf32, #tpu.memory_space<vmem>>, vector<2x1xf32>,
      %c0_38 = arith.constant 0 : index
      %c0_39 = arith.constant 0 : index
      %56 = vector.load %arg9[%c0_38, %c0_39] : memref<2x1xf32, #tpu.memory_space<vmem>>, vector<2x1xf32>
      tpu.vector_store %arg9[%c0_38, %c0_39], %53 {strides = array<i32>} : memref<2x1xf32, #tpu.memory_space<vmem>>, vector<2x1xf32>,
      %cst_40 = arith.constant 0.000000e+00 : f32
      %57 = vector.broadcast %cst_40 : f32 to vector<2x32xf32>
      %c0_41 = arith.constant 0 : index
      %c0_42 = arith.constant 0 : index
      %58 = vector.load %arg10[%c0_41, %c0_42] : memref<2x32xf32, #tpu.memory_space<vmem>>, vector<2x32xf32>
      tpu.vector_store %arg10[%c0_41, %c0_42], %57 {strides = array<i32>} : memref<2x32xf32, #tpu.memory_space<vmem>>, vector<2x32xf32>,
    } else {
    }
    %c0 = arith.constant 0 : index
    %c0_1 = arith.constant 0 : index
    %3 = vector.load %arg11[%c0, %c0_1] : memref<2x1xf32, #tpu.memory_space<vmem>>, vector<2x1xf32>
    %c0_2 = arith.constant 0 : index
    %c0_3 = arith.constant 0 : index
    %4 = vector.load %arg12[%c0_2, %c0_3] : memref<2x1xf32, #tpu.memory_space<vmem>>, vector<2x1xf32>
    %5 = tpu.iota {dimensions = array<i32: 1>} : vector<1x8xi32>
    %c8_i32 = arith.constant 8 : i32
    %6 = arith.muli %arg1, %c8_i32 : i32
    %7 = vector.broadcast %6 : i32 to vector<1x8xi32>
    %8 = arith.addi %5, %7 : vector<1x8xi32>
    %9 = arith.sitofp %8 : vector<1x8xi32> to vector<1x8xf32>
    %cst = arith.constant 8.000000e+00 : f32
    %10 = vector.broadcast %cst : f32 to vector<1x8xf32>
    %11 = arith.divf %9, %10 : vector<1x8xf32>
    %cst_4 = arith.constant 0.000000e+00 : f32
    %12 = vector.broadcast %cst_4 : f32 to vector<2x1xf32>
    %13 = arith.subf %12, %3 : vector<2x1xf32>
    %14 = vector.broadcast %4 : vector<2x1xf32> to vector<2x8xf32>
    %15 = vector.broadcast %11 : vector<1x8xf32> to vector<2x8xf32>
    %16 = arith.subf %14, %15 : vector<2x8xf32>
    %17 = arith.mulf %16, %16 : vector<2x8xf32>
    %18 = vector.broadcast %13 : vector<2x1xf32> to vector<2x8xf32>
    %19 = arith.mulf %18, %17 : vector<2x8xf32>
    %20 = math.exp %19 : vector<2x8xf32>
    %c0_5 = arith.constant 0 : index
    %c0_6 = arith.constant 0 : index
    %21 = vector.load %arg8[%c0_5, %c0_6] : memref<2x8xf32, #tpu.memory_space<vmem>>, vector<2x8xf32>
    tpu.vector_store %arg8[%c0_5, %c0_6], %20 {strides = array<i32>} : memref<2x8xf32, #tpu.memory_space<vmem>>, vector<2x8xf32>,
    %c0_7 = arith.constant 0 : index
    %c0_8 = arith.constant 0 : index
    %c0_9 = arith.constant 0 : index
    %22 = vector.load %arg6[%c0_7, %c0_8, %c0_9] : memref<2x8x32xf32, #tpu.memory_space<vmem>>, vector<1x8x32xf32>
    %23 = vector.shape_cast %22 : vector<1x8x32xf32> to vector<8x32xf32>
    %c0_10 = arith.constant 0 : index
    %c0_11 = arith.constant 0 : index
    %24 = vector.load %arg10[%c0_10, %c0_11] : memref<2x32xf32, #tpu.memory_space<vmem>>, vector<1x32xf32>
    %25 = vector.extract_strided_slice %20 {offsets = [0, 0], sizes = [1, 8], strides = [1, 1]} : vector<2x8xf32> to vector<1x8xf32>
    %cst_12 = arith.constant dense<0.000000e+00> : vector<1x32xf32>
    %26 = tpu.matmul %25, %23, %cst_12 {dimension_numbers = #tpu.dot_dimension_numbers<[1], [0], [0], [1], [0, 0, 1, 1], [], []>} : vector<1x8xf32>, vector<8x32xf32>, vector<1x32xf32> -> vector<1x32xf32>
    %27 = arith.addf %24, %26 : vector<1x32xf32>
    %c0_13 = arith.constant 0 : index
    %c0_14 = arith.constant 0 : index
    %28 = vector.load %arg10[%c0_13, %c0_14] : memref<2x32xf32, #tpu.memory_space<vmem>>, vector<1x32xf32>
    tpu.vector_store %arg10[%c0_13, %c0_14], %27 {strides = array<i32>} : memref<2x32xf32, #tpu.memory_space<vmem>>, vector<1x32xf32>,
    %c1 = arith.constant 1 : index
    %c0_15 = arith.constant 0 : index
    %c0_16 = arith.constant 0 : index
    %29 = vector.load %arg6[%c1, %c0_15, %c0_16] : memref<2x8x32xf32, #tpu.memory_space<vmem>>, vector<1x8x32xf32>
    %30 = vector.shape_cast %29 : vector<1x8x32xf32> to vector<8x32xf32>
    %c1_17 = arith.constant 1 : index
    %c0_18 = arith.constant 0 : index
    %31 = vector.load %arg10[%c1_17, %c0_18] : memref<2x32xf32, #tpu.memory_space<vmem>>, vector<1x32xf32>
    %32 = vector.extract_strided_slice %20 {offsets = [1, 0], sizes = [1, 8], strides = [1, 1]} : vector<2x8xf32> to vector<1x8xf32>
    %cst_19 = arith.constant dense<0.000000e+00> : vector<1x32xf32>
    %33 = tpu.matmul %32, %30, %cst_19 {dimension_numbers = #tpu.dot_dimension_numbers<[1], [0], [0], [1], [0, 0, 1, 1], [], []>} : vector<1x8xf32>, vector<8x32xf32>, vector<1x32xf32> -> vector<1x32xf32>
    %34 = arith.addf %31, %33 : vector<1x32xf32>
    %c1_20 = arith.constant 1 : index
    %c0_21 = arith.constant 0 : index
    %35 = vector.load %arg10[%c1_20, %c0_21] : memref<2x32xf32, #tpu.memory_space<vmem>>, vector<1x32xf32>
    tpu.vector_store %arg10[%c1_20, %c0_21], %34 {strides = array<i32>} : memref<2x32xf32, #tpu.memory_space<vmem>>, vector<1x32xf32>,
    %c0_i32_22 = arith.constant 0 : i32
    %36 = arith.cmpi eq, %arg1, %c0_i32_22 : i32
    %37 = arith.extui %36 : i1 to i32
    %c0_i32_23 = arith.constant 0 : i32
    %38 = arith.cmpi ne, %37, %c0_i32_23 : i32
    scf.if %38 {
      %c0_24 = arith.constant 0 : index
      %c0_25 = arith.constant 0 : index
      %39 = vector.load %arg10[%c0_24, %c0_25] : memref<2x32xf32, #tpu.memory_space<vmem>>, vector<2x32xf32>
      %c0_26 = arith.constant 0 : index
      %c0_27 = arith.constant 0 : index
      %40 = vector.load %arg7[%c0_26, %c0_27] : memref<2x32xf32, #tpu.memory_space<vmem>>, vector<2x32xf32>
      tpu.vector_store %arg7[%c0_26, %c0_27], %39 {strides = array<i32>} : memref<2x32xf32, #tpu.memory_space<vmem>>, vector<2x32xf32>,
    } else {
    }
    return
  }
  func.func @transform_0(%arg0: i32, %arg1: i32) -> (i32, i32) {
    %c0_i32 = arith.constant 0 : i32
    %c0_i32_0 = arith.constant 0 : i32
    return %arg0, %c0_i32 : i32, i32
  }
  func.func @transform_1(%arg0: i32, %arg1: i32) -> (i32, i32) {
    %c0_i32 = arith.constant 0 : i32
    %c0_i32_0 = arith.constant 0 : i32
    %c0_i32_1 = arith.constant 0 : i32
    return %c0_i32, %c0_i32_0 : i32, i32
  }
  func.func @transform_2(%arg0: i32, %arg1: i32) -> (i32, i32) {
    %c0_i32 = arith.constant 0 : i32
    %c0_i32_0 = arith.constant 0 : i32
    %c0_i32_1 = arith.constant 0 : i32
    return %c0_i32, %c0_i32_0 : i32, i32
  }
  func.func @transform_3(%arg0: i32, %arg1: i32) -> (i32, i32) {
    %c0_i32 = arith.constant 0 : i32
    %c0_i32_0 = arith.constant 0 : i32
    return %arg0, %c0_i32 : i32, i32
  }
  func.func @transform_4(%arg0: i32, %arg1: i32) -> (i32, i32, i32) {
    %c0_i32 = arith.constant 0 : i32
    %c0_i32_0 = arith.constant 0 : i32
    return %arg0, %arg1, %c0_i32 : i32, i32, i32
  }
  func.func @transform_5(%arg0: i32, %arg1: i32) -> (i32, i32) {
    %c0_i32 = arith.constant 0 : i32
    %c0_i32_0 = arith.constant 0 : i32
    return %arg0, %c0_i32 : i32, i32
  }
  func.func @transform_6(%arg0: i32, %arg1: i32) -> (i32, i32) {
    %c0_i32 = arith.constant 0 : i32
    return %arg0, %arg1 : i32, i32
  }
  func.func @transform_7(%arg0: i32, %arg1: i32) -> (i32, i32) {
    %c0_i32 = arith.constant 0 : i32
    %c0_i32_0 = arith.constant 0 : i32
    return %arg0, %c0_i32 : i32, i32
  }
}

</mosaic_0001>

<bundles_post_ra>
// kernel: tpu_custom_call.1
= control target key start
LH: loop header
LB: loop body
LE: loop exit
PB: predicated region body
PF: predicated region fallthrough
CT: control target
= control target key end

     0   :  { %13 = vsyncpa [#allocation6], 0  ;;  %s384_s0 = inlined_call_operand.vmem [shape: f32[2,32], index: 0, kind: input, shape index: {}]   ;;  %s385_s1 = inlined_call_operand.vmem [shape: f32[1,32], index: 1, kind: input, shape index: {}]   ;;  %s386_s2 = inlined_call_operand.vmem [shape: f32[1,32], index: 2, kind: input, shape index: {}]   ;;  %s387_s3 = inlined_call_operand.vmem [shape: f32[2,1], index: 3, kind: input, shape index: {}]   ;;  %s388_s4 = inlined_call_operand.hbm [shape: f32[2,8,32], index: 4, kind: input, shape index: {}]   ;;  %s389_s5 = inlined_call_operand.hbm [shape: f32[2,32], index: 5, kind: output, shape index: {0}]   ;;  %s390_s6 = inlined_call_operand.hbm [shape: f32[2,8], index: 6, kind: output, shape index: {1}]   ;;  %s391_s7 = inlined_call_operand.vmem [shape: f32[2,1], index: 7, kind: output, shape index: {2}]  }
   0x1   :  { %14 = vsyncpa [#allocation7], 0 }
   0x2   :  { %15 = vsyncpa [#allocation10], 0  ;;  %s28_s26 = sshll.u32 %s388_s4, 4  ;;  %s308_s27 = smov [#allocation5]   ;;  %s29_s26 = int_to_ptr.hbm [resolvable:$true] %s28_s26 }
   0x3   :  { %s30_s28 = sshll.u32 %s308_s27, 4  ;;  %s309_s29 = smov 128   ;;  %s31_s28 = int_to_ptr.vmem [resolvable:$true] %s30_s28 }
   0x4   :  { %s310_s30 = smov 8  }
   0x5   :  { %36 = dma.hbm_to_vmem [thread:$0]  %s29_s26, 256, %s31_s28, [#allocation6], %s309_s29, %s309_s29, %s310_s30  }
   0x6   :  { %302 = dma.done.wait [#allocation6], 256  }
   0x7   :  { %303 = vsyncadd [#allocation6], 4294967040  ;;  %vm51_vm0 = vcmask 254976   ;;  %v311_v0 = vmov 0.0   ;;  %v45_v1 = vld [vmem:[%s384_s0] sm:$0x3]  ;;  %v76_v25 = vlaneseq }
   0x8   :  { %73 = vst.msk [vmem:[#allocation2] sm:$0x3] %vm51_vm0, %v311_v0  ;;  %v220_v2 = vld [vmem:[%s386_s2] ss:$0 sm:$0xff]  ;;  %v312_v8 = vmov 0   ;;  %vm69_vm1 = vcmask 1024  }
   0x9   :  { %v62_v3 = vmul.f32 %v220_v2, %v45_v1  ;;  %v221_v4 = vld [vmem:[%s385_s1] ss:$0 sm:$0xff]  ;;  %218 = vset.pattern.permute.xlu1 %v312_v8  ;;  %219 = vset.pattern.permute.xlu0 %v312_v8  ;;  %v313_v20 = vmov 8.0   ;;  %v108_v23 = vld [vmem:[#allocation5] sm:$0xff]  ;;  %v138_v27 = vld [vmem:[#allocation5 + $0x8] sm:$0xff]  ;;  %v77_v28 = vand.u32 127, %v76_v25 }
   0xa   :  { %v50_v6 = vmul.f32 %v221_v4, %v45_v1  ;;  %v57_v11 = vld [vmem:[%s387_s3] sm:$0x3]  ;;  %129 = vmatpush.msra.mxu0 %v108_v23  ;;  %158 = vmatpush.msra.mxu1 %v138_v27  ;;  %vm110_vm3 = vcmask 64512   ;;  %vm106_vm4 = vcmask 58368   ;;  %s314_s3 = smov [#allocation9]   ;;  %s189_s16 = sshll.u32 %s390_s6, 4  ;;  %s190_s16 = int_to_ptr.hbm [resolvable:$true] %s189_s16 }
   0xb   :  { %v63_v5 = vsel %vm51_vm0, %v62_v3, 0.0  ;;  %v81_v30 = vcvt.s32.f32 %v77_v28  ;;  %vm135_vm5 = vcmask 253952   ;;  %s315_s17 = smov [#allocation8]   ;;  %s178_s21 = sshll.u32 %s389_s5, 4  ;;  %s179_s21 = int_to_ptr.hbm [resolvable:$true] %s178_s21 }
   0xc   :  { %64 = vadd.xlane.f32.xlu0 %v63_v5  ;;  %v52_v7 = vsel %vm51_vm0, %v50_v6, 0.0  ;;  %s176_s18 = sshll.u32 %s315_s17, 4  ;;  %s177_s18 = int_to_ptr.vmem [resolvable:$true] %s176_s18 }
   0xf   :  { %v109_v41 = vld [vmem:[#allocation2] sm:$0x1]  ;;  %v139_v43 = vld [vmem:[#allocation2 + $0x1] sm:$0x1] }
  0x14   :  { %53 = vadd.xlane.f32.xlu0 %v52_v7 }
  0x7f   :  { %v65_v9 = vpop.xlane.xlu0 %64 }
  0x80   :  { %v66_v10 = vmul.f32 1.442695, %v65_v9 }
  0x82   :  { %222 = vpow2.f32 %v66_v10 }
  0x87   :  { %v54_v12 = vpop.xlane.xlu0 %53 }
  0x88   :  { %v223_v13 = vpop.eup %222  ;;  %v55_v14 = vmul.f32 1.442695, %v54_v12 }
  0x89   :  { %v68_v15 = vadd.f32 %v223_v13, %v57_v11 }
  0x8a   :  { %224 = vpow2.f32 %v55_v14 }
  0x8b   :  { %71 = vst.msk [vmem:[#allocation4] sm:$0x3] %vm69_vm1, %v68_v15  ;;  %226 = vrcp.f32 %v313_v20 }
  0x8c   :  { %72 = vst.msk [vmem:[%s391_s7] sm:$0x3] %vm69_vm1, %v68_v15  ;;  %s187_s7 = sshll.u32 %s314_s3, 4  ;;  %s188_s7 = int_to_ptr.vmem [resolvable:$true] %s187_s7 }
  0x90   :  { %v225_v16 = vpop.eup %224 }
  0x91   :  { %70 = vst.msk [vmem:[#allocation3] sm:$0x3] %vm69_vm1, %v225_v16  ;;  %v227_v21 = vpop.eup %226 }
  0x92   :  { %v75_v17 = vld [vmem:[#allocation4] sm:$0x3]  ;;  %v83_v22 = vmul.f32 8.0, %v227_v21  ;;  %vm87_vm2 = vweird.f32 %v227_v21 }
  0x93   :  { %93 = vperm.xlu1 %218, %v75_v17  }
  0x94   :  { %v84_v24 = vsub.f32 1.0, %v83_v22 }
  0x96   :  { %v85_v26 = vmul.f32 %v227_v21, %v84_v24 }
  0x98   :  { %v74_v18 = vld [vmem:[#allocation3] sm:$0x3]  ;;  %v86_v29 = vadd.f32 %v227_v21, %v85_v26 }
  0x99   :  { %v90_v19 = vsub.f32 0.0, %v74_v18 }
  0x9a   :  { %v88_v31 = vsel %vm87_vm2, %v227_v21, %v86_v29 }
  0x9b   :  { %100 = vperm.xlu1 %218, %v90_v19   ;;  %v89_v32 = vmul.f32 %v88_v31, %v81_v30 }
 0x105   :  { %v94_v33 = vpop.permute.xlu1 %93 }
 0x106   :  { %v96_v34 = vsub.f32 %v94_v33, %v89_v32 }
 0x108   :  { %v97_v35 = vmul.f32 %v96_v34, %v96_v34 }
 0x10d   :  { %v101_v36 = vpop.permute.xlu1 %100 }
 0x10e   :  { %v103_v37 = vmul.f32 %v101_v36, %v97_v35 }
 0x110   :  { %v104_v38 = vmul.f32 1.442695, %v103_v37 }
 0x112   :  { %228 = vpow2.f32 %v104_v38 }
 0x118   :  { %v229_v39 = vpop.eup %228 }
 0x119   :  { %208 = vmatmul.msk.f32.vlgmr.msra.gmra.mxu0 %vm110_vm3, %v229_v39  ;;  %v140_v40 = vrot.slane %v229_v39, 1  ;;  %107 = vst.msk [vmem:[#allocation9] sm:$0x3] %vm106_vm4, %v229_v39 }
 0x11a   :  { %192 = dma.vmem_to_hbm [thread:$0]  %s188_s7, 32, %s190_s16, [#allocation10]  }
 0x11b   :  { %209 = vmatmul.msk.f32.vlgmr.msra.gmra.mxu1 %vm110_vm3, %v140_v40 }
 0x196   :  { %v131_v42 = vpop.f32.mrf.mxu0 }
 0x197   :  { %v134_v44 = vadd.f32 %v131_v42, %v109_v41 }
 0x198   :  { %v160_v45 = vpop.f32.mrf.mxu1 }
 0x199   :  { %136 = vst.msk [vmem:[#allocation2] sm:$0x1] %vm135_vm5, %v134_v44  ;;  %v163_v46 = vadd.f32 %v160_v45, %v139_v43 }
 0x19b   :  { %164 = vst.msk [vmem:[#allocation2 + $0x1] sm:$0x1] %vm135_vm5, %v163_v46 }
 0x1a2   :  { %v168_v47 = vld [vmem:[#allocation2] sm:$0x3] }
 0x1a3   :  { %170 = vst.msk [vmem:[#allocation8] sm:$0x3] %vm51_vm0, %v168_v47 }
 0x1a4   :  { %181 = dma.vmem_to_hbm [thread:$0]  %s177_s18, 32, %s179_s21, [#allocation7]  }
 0x1a5   :  { %304 = dma.done.wait [#allocation7], 32  }
 0x1a6   :  { %305 = vsyncadd [#allocation7], 4294967264 }
 0x1a7   :  { %306 = dma.done.wait [#allocation10], 32  }
 0x1a8   :  { %307 = vsyncadd [#allocation10], 4294967264 }
 0x1a9   :  { %205 = vsyncpa [#allocation6], 1 }
 0x1aa   :  { %206 = vsyncpa [#allocation7], 1 }
 0x1ab   :  { %207 = vsyncpa [#allocation10], 1 }

</bundles_post_ra>
